<compile_context>
chip_gen: v7x
topology: tpu7x:2x2x1
jax: 0.10.0
libtpu: 0.0.40
codegen_flags: <defaults>
</compile_context>

<pallas_src>
import jax
import jax.numpy as jnp
from jax.experimental import pallas as pl
from jax.experimental.pallas import tpu as pltpu


# ---------------------------------------------------------------------------
# Hardware query (generation-aware block sizing), with safe fallbacks.
# ---------------------------------------------------------------------------
def _tpu_hw():
    """Returns (vmem_capacity_bytes, num_tensorcores_per_device)."""
    vmem = 64 * 1024 * 1024          # conservative default: v7x has 64 MiB / TC
    try:
        vmem = int(pltpu.get_tpu_info().vmem_capacity_bytes)
    except Exception:
        pass
    num_tc = 2                       # conservative: assume multi-TC -> keep >=2 grid steps
    try:
        kind = jax.devices()[0].device_kind.lower()
        if ("lite" in kind or "v5e" in kind or "v6e" in kind
                or "v2" in kind or "v3" in kind):
            num_tc = 1               # single TensorCore per device
    except Exception:
        pass
    return vmem, num_tc


def _round_up(a, b):
    return -(-a // b) * b


def _sublane(itemsize):
    return {4: 8, 2: 16, 1: 32}.get(itemsize, 8)


def _plan_blocks(N, num_level, channel, HW, itemsize, hidden, vmem_bytes, num_tc):
    """Pick batch-block size nb and vmem_limit from *padded* tile sizes.

    Returns (nb, vmem_limit_bytes), or (None, None) if even a single image
    does not fit the budget (caller falls back to XLA)."""
    C = channel * num_level
    sub = _sublane(itemsize)
    pad_hw = _round_up(HW, 128)              # lane padding
    pad_ch = _round_up(channel, sub)         # sublane padding, per-level input block
    pad_C = _round_up(C, sub)                # sublane padding, output block
    # Padded VMEM bytes per batch element: num_level input slabs + one output.
    per_n = itemsize * pad_hw * (num_level * pad_ch + pad_C)
    # ~60% of physical VMEM for the double-buffered in+out blocks:
    #   128 MiB chips (v5e/v6e): ~77 MiB budget;  64 MiB chips (v7x): ~38 MiB.
    budget = int(0.6 * vmem_bytes)
    max_nb = budget // (2 * per_n)           # 2x: double buffering
    if max_nb < 1:
        # TODO(synk): spatial-tile HW instead of falling back for very large images.
        return None, None
    cap = min(N, max_nb)
    if num_tc >= 2 and N >= 2:
        # Keep >= 2 grid steps so dimension_semantics=("parallel",) feeds both
        # TensorCores (v7x / megacore).  Single-TC chips skip this halving.
        cap = min(cap, max(1, N // 2))
    # Largest divisor of N that is <= cap (avoid collapsing to nb=1 for odd N).
    nb = 1
    for d in range(cap, 0, -1):
        if N % d == 0:
            nb = d
            break
    params_bytes = 4 * (C * hidden + hidden + hidden * C + C)
    usage = 2 * nb * per_n + 2 * params_bytes
    vmem_limit = min(vmem_bytes, max(32 * 1024 * 1024, usage + 8 * 1024 * 1024))
    return nb, int(vmem_limit)


# ---------------------------------------------------------------------------
# Kernel.
# ---------------------------------------------------------------------------
def _make_sfam_kernel(num_level, channel):
    """SE block over one (nb, C, HW) output block; inputs are per-level slabs."""

    def kernel(*refs):
        x_refs = refs[:num_level]                         # each (nb, channel, HW)
        w1_ref, b1_ref, w2_ref, b2_ref, o_ref = refs[num_level:]

        hw = x_refs[0].shape[-1]
        inv_hw = 1.0 / hw

        # Pass 1: AdaptiveAvgPool2d(1) == mean over the spatial (lane) axis,
        # accumulated in f32.  Only tiny (nb, channel) sums stay live after
        # this pass, keeping vreg live ranges short.
        pooled = [jnp.sum(x_refs[j][...].astype(jnp.float32), axis=-1) * inv_hw
                  for j in range(num_level)]
        y = jnp.concatenate(pooled, axis=-1)              # (nb, C) f32

        # fc1 -> ReLU -> fc2 -> sigmoid (1x1 convs on 1x1 maps == matmuls).
        h = jnp.dot(y, w1_ref[...], preferred_element_type=jnp.float32) + b1_ref[...]
        h = jnp.maximum(h, 0.0)
        s = jnp.dot(h, w2_ref[...], preferred_element_type=jnp.float32) + b2_ref[...]
        s = jax.nn.sigmoid(s)                             # (nb, C) f32
        # Rescale in the input dtype (bf16 VALU on v6e/v7x; identity for f32).
        s = s.astype(o_ref.dtype)

        # Pass 2: re-read each level slab (fresh, short live range) and write
        # its channel slice of the fused-concat output.  With channel a
        # multiple of the sublane tile (8 f32 / 16 bf16) — true for the real
        # SFAM config (channel=128) — these are dense, unmasked stores.
        for j in range(num_level):
            lo = j * channel
            sj = s[:, lo:lo + channel]                    # (nb, channel)
            o_ref[:, lo:lo + channel, :] = (
                x_refs[j][...] * sj[:, :, None]).astype(o_ref.dtype)

    return kernel


def _sfam_scale_pallas(levels, w1_t, b1, w2_t, b2, nb, vmem_limit):
    """levels: list of num_level arrays, each (N, channel, HW) -> (N, C, HW)."""
    num_level = len(levels)
    N, channel, HW = levels[0].shape
    C = channel * num_level
    hidden = w1_t.shape[1]
    dtype = levels[0].dtype

    grid = (N // nb,)
    level_spec = pl.BlockSpec((nb, channel, HW), lambda n: (n, 0, 0))
    in_specs = [level_spec] * num_level + [
        pl.BlockSpec((C, hidden), lambda n: (0, 0)),
        pl.BlockSpec((1, hidden), lambda n: (0, 0)),
        pl.BlockSpec((hidden, C), lambda n: (0, 0)),
        pl.BlockSpec((1, C), lambda n: (0, 0)),
    ]
    out_specs = pl.BlockSpec((nb, C, HW), lambda n: (n, 0, 0))

    return pl.pallas_call(
        _make_sfam_kernel(num_level, channel),
        out_shape=jax.ShapeDtypeStruct((N, C, HW), dtype),
        grid=grid,
        in_specs=in_specs,
        out_specs=out_specs,
        compiler_params=pltpu.CompilerParams(
            dimension_semantics=("parallel",),
            vmem_limit_bytes=int(vmem_limit),
        ),
    )(*levels, w1_t, b1, w2_t, b2)


def _sfam_scale_xla(levels, w1_t, b1, w2_t, b2):
    """Plain-XLA path for tiny pyramid scales (or oversize fallback)."""
    out = jnp.concatenate(levels, axis=1)                       # (N, C, HW)
    y = jnp.mean(out.astype(jnp.float32), axis=-1)              # (N, C)
    h = jnp.maximum(jnp.dot(y, w1_t) + b1, 0.0)
    s = jax.nn.sigmoid(jnp.dot(h, w2_t) + b2).astype(out.dtype)
    return out * s[:, :, None]


# ---------------------------------------------------------------------------
# Forward wrapper.
# ---------------------------------------------------------------------------
def sfam_forward(x, w1, b1, w2, b2):
    """x: list (num_level) of lists (num_scales) of NCHW arrays.
    w1: (hidden, C, 1, 1), b1: (hidden,), w2: (C, hidden, 1, 1), b2: (C,).
    The single (w1, b1, w2, b2) set is shared across all scales, matching
    nn.ModuleList([conv] * num_scales) in the PyTorch module."""
    num_level = len(x)
    num_scales = len(x[0])
    hidden, C = w1.shape[0], w1.shape[1]
    w1_t = w1.reshape(hidden, C).T.astype(jnp.float32)          # (C, hidden)
    w2_t = w2.reshape(C, hidden).T.astype(jnp.float32)          # (hidden, C)
    b1r = b1.reshape(1, hidden).astype(jnp.float32)
    b2r = b2.reshape(1, C).astype(jnp.float32)

    vmem_bytes, num_tc = _tpu_hw()

    results = []
    for i in range(num_scales):
        levels = [x[j][i] for j in range(num_level)]            # each (N, ch, H, W)
        N, ch, H, W = levels[0].shape
        assert ch * num_level == C
        HW = H * W
        # Pure reshape of contiguous NCHW (free) — NO transpose.
        levels_flat = [lv.reshape(N, ch, HW) for lv in levels]
        itemsize = jnp.dtype(levels[0].dtype).itemsize

        if HW < 128:
            # Tiny pyramid scales: HW on the lane axis would pad up to 128
            # (lane-sparse VMEM, masked partial stores, tiny DMA rows) and the
            # tensors are small enough that per-pallas_call fixed cost
            # dominates — plain XLA fusion is strictly better here.
            o_flat = _sfam_scale_xla(levels_flat, w1_t, b1r, w2_t, b2r)
        else:
            nb, vmem_limit = _plan_blocks(N, num_level, ch, HW, itemsize,
                                          hidden, vmem_bytes, num_tc)
            if nb is None:
                o_flat = _sfam_scale_xla(levels_flat, w1_t, b1r, w2_t, b2r)
            else:
                o_flat = _sfam_scale_pallas(levels_flat, w1_t, b1r, w2_t, b2r,
                                            nb, vmem_limit)
        results.append(o_flat.reshape(N, C, H, W))
    return results


def _reference(x, w1, b1, w2, b2):
    """Pure-JAX reference matching the PyTorch forward."""
    num_level = len(x)
    num_scales = len(x[0])
    hidden, C = w1.shape[0], w1.shape[1]
    res = []
    for i in range(num_scales):
        out = jnp.concatenate([x[j][i] for j in range(num_level)], axis=1)  # (N,C,H,W)
        y = jnp.mean(out, axis=(2, 3))                                      # (N,C)
        y = jnp.maximum(y @ w1.reshape(hidden, C).T + b1, 0.0)              # (N,hidden)
        y = jax.nn.sigmoid(y @ w2.reshape(C, hidden).T + b2)                # (N,C)
        res.append(out * y[:, :, None, None])
    return res


if __name__ == "__main__":
    # Small, shape-consistent config: channel=8 per level, num_level=4 -> C=32,
    # reduction=4 -> hidden=8, num_scales=2, batch=2, spatial sizes 16 and 8
    # (HW=256 exercises the Pallas path; HW=64 exercises the tiny-scale XLA
    # fallback path).  channel=8 keeps the per-level channel-slice stores
    # sublane-tile aligned, like the real SFAM config (channel=128).
    channel, num_level, num_scales, reduction = 8, 4, 2, 4
    C = channel * num_level
    hidden = C // reduction
    N = 2
    spatial = [16, 8]

    key = jax.random.PRNGKey(0)
    keys = jax.random.split(key, num_level * num_scales + 4)

    # Input pyramid: x[level][scale] with NCHW shape (N, channel, H_i, W_i)
    x = []
    k_idx = 0
    for j in range(num_level):
        row = []
        for i in range(num_scales):
            row.append(jax.random.normal(
                keys[k_idx], (N, channel, spatial[i], spatial[i]),
                dtype=jnp.float32))
            k_idx += 1
        x.append(row)

    # Shared SE parameters (single fc1/fc2 shared across scales).
    w1 = jax.random.normal(keys[k_idx], (hidden, C, 1, 1), dtype=jnp.float32) * 0.1
    b1 = jax.random.normal(keys[k_idx + 1], (hidden,), dtype=jnp.float32) * 0.1
    w2 = jax.random.normal(keys[k_idx + 2], (C, hidden, 1, 1), dtype=jnp.float32) * 0.1
    b2 = jax.random.normal(keys[k_idx + 3], (C,), dtype=jnp.float32) * 0.1

    outs = sfam_forward(x, w1, b1, w2, b2)
    outs = [jax.block_until_ready(o) for o in outs]

    refs = _reference(x, w1, b1, w2, b2)
    for o, r in zip(outs, refs):
        assert o.shape == r.shape
        assert jnp.allclose(o, r, atol=1e-5, rtol=1e-5), "mismatch vs reference"

    print("KERNEL_OK")
</pallas_src>

<mosaic_0001>
module attributes {stable_mosaic.version = 11 : i64} {
  func.func @kernel(%arg0: i32, %arg1: memref<1x8x256xf32, #tpu.memory_space<vmem>>, %arg2: memref<1x8x256xf32, #tpu.memory_space<vmem>>, %arg3: memref<1x8x256xf32, #tpu.memory_space<vmem>>, %arg4: memref<1x8x256xf32, #tpu.memory_space<vmem>>, %arg5: memref<32x8xf32, #tpu.memory_space<vmem>>, %arg6: memref<1x8xf32, #tpu.memory_space<vmem>>, %arg7: memref<8x32xf32, #tpu.memory_space<vmem>>, %arg8: memref<1x32xf32, #tpu.memory_space<vmem>>, %arg9: memref<1x32x256xf32, #tpu.memory_space<vmem>>) attributes {dimension_semantics = [#tpu.dimension_semantics<parallel>], iteration_bounds = array<i64: 2>, scalar_prefetch = 0 : i64, scratch_operands = 0 : i64, tpu.core_type = #tpu.core_type<tc>, window_params = [{transform_indices = @transform_0, window_bounds = array<i64: 1, 8, 256>}, {transform_indices = @transform_1, window_bounds = array<i64: 1, 8, 256>}, {transform_indices = @transform_2, window_bounds = array<i64: 1, 8, 256>}, {transform_indices = @transform_3, window_bounds = array<i64: 1, 8, 256>}, {pipeline_mode = #tpu.pipeline_mode<synchronous>, transform_indices = @transform_4, window_bounds = array<i64: 32, 8>}, {pipeline_mode = #tpu.pipeline_mode<synchronous>, transform_indices = @transform_5, window_bounds = array<i64: 1, 8>}, {pipeline_mode = #tpu.pipeline_mode<synchronous>, transform_indices = @transform_6, window_bounds = array<i64: 8, 32>}, {pipeline_mode = #tpu.pipeline_mode<synchronous>, transform_indices = @transform_7, window_bounds = array<i64: 1, 32>}, {transform_indices = @transform_8, window_bounds = array<i64: 1, 32, 256>}]} {
    %c0 = arith.constant 0 : index
    %c0_0 = arith.constant 0 : index
    %c0_1 = arith.constant 0 : index
    %0 = vector.load %arg1[%c0, %c0_0, %c0_1] : memref<1x8x256xf32, #tpu.memory_space<vmem>>, vector<1x8x256xf32>
    %cst = arith.constant dense<0.000000e+00> : vector<1x8xf32>
    %1 = vector.multi_reduction <add>, %0, %cst [2] : vector<1x8x256xf32> to vector<1x8xf32>
    %cst_2 = arith.constant 3.906250e-03 : f32
    %2 = vector.broadcast %cst_2 : f32 to vector<1x8xf32>
    %3 = arith.mulf %1, %2 : vector<1x8xf32>
    %c0_3 = arith.constant 0 : index
    %c0_4 = arith.constant 0 : index
    %c0_5 = arith.constant 0 : index
    %4 = vector.load %arg2[%c0_3, %c0_4, %c0_5] : memref<1x8x256xf32, #tpu.memory_space<vmem>>, vector<1x8x256xf32>
    %cst_6 = arith.constant dense<0.000000e+00> : vector<1x8xf32>
    %5 = vector.multi_reduction <add>, %4, %cst_6 [2] : vector<1x8x256xf32> to vector<1x8xf32>
    %cst_7 = arith.constant 3.906250e-03 : f32
    %6 = vector.broadcast %cst_7 : f32 to vector<1x8xf32>
    %7 = arith.mulf %5, %6 : vector<1x8xf32>
    %c0_8 = arith.constant 0 : index
    %c0_9 = arith.constant 0 : index
    %c0_10 = arith.constant 0 : index
    %8 = vector.load %arg3[%c0_8, %c0_9, %c0_10] : memref<1x8x256xf32, #tpu.memory_space<vmem>>, vector<1x8x256xf32>
    %cst_11 = arith.constant dense<0.000000e+00> : vector<1x8xf32>
    %9 = vector.multi_reduction <add>, %8, %cst_11 [2] : vector<1x8x256xf32> to vector<1x8xf32>
    %cst_12 = arith.constant 3.906250e-03 : f32
    %10 = vector.broadcast %cst_12 : f32 to vector<1x8xf32>
    %11 = arith.mulf %9, %10 : vector<1x8xf32>
    %c0_13 = arith.constant 0 : index
    %c0_14 = arith.constant 0 : index
    %c0_15 = arith.constant 0 : index
    %12 = vector.load %arg4[%c0_13, %c0_14, %c0_15] : memref<1x8x256xf32, #tpu.memory_space<vmem>>, vector<1x8x256xf32>
    %cst_16 = arith.constant dense<0.000000e+00> : vector<1x8xf32>
    %13 = vector.multi_reduction <add>, %12, %cst_16 [2] : vector<1x8x256xf32> to vector<1x8xf32>
    %cst_17 = arith.constant 3.906250e-03 : f32
    %14 = vector.broadcast %cst_17 : f32 to vector<1x8xf32>
    %15 = arith.mulf %13, %14 : vector<1x8xf32>
    %16 = tpu.concatenate %3, %7, %11, %15 in 1 : vector<1x8xf32>, vector<1x8xf32>, vector<1x8xf32>, vector<1x8xf32> -> vector<1x32xf32>
    %c0_18 = arith.constant 0 : index
    %c0_19 = arith.constant 0 : index
    %17 = vector.load %arg5[%c0_18, %c0_19] : memref<32x8xf32, #tpu.memory_space<vmem>>, vector<32x8xf32>
    %cst_20 = arith.constant dense<0.000000e+00> : vector<1x8xf32>
    %18 = tpu.matmul %16, %17, %cst_20 {dimension_numbers = #tpu.dot_dimension_numbers<[1], [0], [0], [1], [0, 0, 1, 1], [], []>} : vector<1x32xf32>, vector<32x8xf32>, vector<1x8xf32> -> vector<1x8xf32>
    %c0_21 = arith.constant 0 : index
    %c0_22 = arith.constant 0 : index
    %19 = vector.load %arg6[%c0_21, %c0_22] : memref<1x8xf32, #tpu.memory_space<vmem>>, vector<1x8xf32>
    %20 = arith.addf %18, %19 : vector<1x8xf32>
    %cst_23 = arith.constant 0.000000e+00 : f32
    %21 = vector.broadcast %cst_23 : f32 to vector<1x8xf32>
    %22 = arith.maximumf %20, %21 : vector<1x8xf32>
    %c0_24 = arith.constant 0 : index
    %c0_25 = arith.constant 0 : index
    %23 = vector.load %arg7[%c0_24, %c0_25] : memref<8x32xf32, #tpu.memory_space<vmem>>, vector<8x32xf32>
    %cst_26 = arith.constant dense<0.000000e+00> : vector<1x32xf32>
    %24 = tpu.matmul %22, %23, %cst_26 {dimension_numbers = #tpu.dot_dimension_numbers<[1], [0], [0], [1], [0, 0, 1, 1], [], []>} : vector<1x8xf32>, vector<8x32xf32>, vector<1x32xf32> -> vector<1x32xf32>
    %c0_27 = arith.constant 0 : index
    %c0_28 = arith.constant 0 : index
    %25 = vector.load %arg8[%c0_27, %c0_28] : memref<1x32xf32, #tpu.memory_space<vmem>>, vector<1x32xf32>
    %26 = arith.addf %24, %25 : vector<1x32xf32>
    %27 = arith.negf %26 : vector<1x32xf32>
    %28 = math.exp %27 : vector<1x32xf32>
    %cst_29 = arith.constant 1.000000e+00 : f32
    %29 = vector.broadcast %cst_29 : f32 to vector<1x32xf32>
    %30 = arith.addf %29, %28 : vector<1x32xf32>
    %31 = arith.divf %29, %30 : vector<1x32xf32>
    %32 = vector.extract_strided_slice %31 {offsets = [0, 0], sizes = [1, 8], strides = [1, 1]} : vector<1x32xf32> to vector<1x8xf32>
    %c0_30 = arith.constant 0 : index
    %c0_31 = arith.constant 0 : index
    %c0_32 = arith.constant 0 : index
    %33 = vector.load %arg1[%c0_30, %c0_31, %c0_32] : memref<1x8x256xf32, #tpu.memory_space<vmem>>, vector<1x8x256xf32>
    %34 = vector.shape_cast %32 : vector<1x8xf32> to vector<1x8x1xf32>
    %35 = vector.broadcast %34 : vector<1x8x1xf32> to vector<1x8x256xf32>
    %36 = arith.mulf %33, %35 : vector<1x8x256xf32>
    %c0_33 = arith.constant 0 : index
    %c0_34 = arith.constant 0 : index
    %c0_35 = arith.constant 0 : index
    %37 = vector.load %arg9[%c0_33, %c0_34, %c0_35] : memref<1x32x256xf32, #tpu.memory_space<vmem>>, vector<1x8x256xf32>
    tpu.vector_store %arg9[%c0_33, %c0_34, %c0_35], %36 {strides = array<i32>} : memref<1x32x256xf32, #tpu.memory_space<vmem>>, vector<1x8x256xf32>,
    %38 = vector.extract_strided_slice %31 {offsets = [0, 8], sizes = [1, 8], strides = [1, 1]} : vector<1x32xf32> to vector<1x8xf32>
    %c0_36 = arith.constant 0 : index
    %c0_37 = arith.constant 0 : index
    %c0_38 = arith.constant 0 : index
    %39 = vector.load %arg2[%c0_36, %c0_37, %c0_38] : memref<1x8x256xf32, #tpu.memory_space<vmem>>, vector<1x8x256xf32>
    %40 = vector.shape_cast %38 : vector<1x8xf32> to vector<1x8x1xf32>
    %41 = vector.broadcast %40 : vector<1x8x1xf32> to vector<1x8x256xf32>
    %42 = arith.mulf %39, %41 : vector<1x8x256xf32>
    %c0_39 = arith.constant 0 : index
    %c8 = arith.constant 8 : index
    %c0_40 = arith.constant 0 : index
    %43 = vector.load %arg9[%c0_39, %c8, %c0_40] : memref<1x32x256xf32, #tpu.memory_space<vmem>>, vector<1x8x256xf32>
    tpu.vector_store %arg9[%c0_39, %c8, %c0_40], %42 {strides = array<i32>} : memref<1x32x256xf32, #tpu.memory_space<vmem>>, vector<1x8x256xf32>,
    %44 = vector.extract_strided_slice %31 {offsets = [0, 16], sizes = [1, 8], strides = [1, 1]} : vector<1x32xf32> to vector<1x8xf32>
    %c0_41 = arith.constant 0 : index
    %c0_42 = arith.constant 0 : index
    %c0_43 = arith.constant 0 : index
    %45 = vector.load %arg3[%c0_41, %c0_42, %c0_43] : memref<1x8x256xf32, #tpu.memory_space<vmem>>, vector<1x8x256xf32>
    %46 = vector.shape_cast %44 : vector<1x8xf32> to vector<1x8x1xf32>
    %47 = vector.broadcast %46 : vector<1x8x1xf32> to vector<1x8x256xf32>
    %48 = arith.mulf %45, %47 : vector<1x8x256xf32>
    %c0_44 = arith.constant 0 : index
    %c16 = arith.constant 16 : index
    %c0_45 = arith.constant 0 : index
    %49 = vector.load %arg9[%c0_44, %c16, %c0_45] : memref<1x32x256xf32, #tpu.memory_space<vmem>>, vector<1x8x256xf32>
    tpu.vector_store %arg9[%c0_44, %c16, %c0_45], %48 {strides = array<i32>} : memref<1x32x256xf32, #tpu.memory_space<vmem>>, vector<1x8x256xf32>,
    %50 = vector.extract_strided_slice %31 {offsets = [0, 24], sizes = [1, 8], strides = [1, 1]} : vector<1x32xf32> to vector<1x8xf32>
    %c0_46 = arith.constant 0 : index
    %c0_47 = arith.constant 0 : index
    %c0_48 = arith.constant 0 : index
    %51 = vector.load %arg4[%c0_46, %c0_47, %c0_48] : memref<1x8x256xf32, #tpu.memory_space<vmem>>, vector<1x8x256xf32>
    %52 = vector.shape_cast %50 : vector<1x8xf32> to vector<1x8x1xf32>
    %53 = vector.broadcast %52 : vector<1x8x1xf32> to vector<1x8x256xf32>
    %54 = arith.mulf %51, %53 : vector<1x8x256xf32>
    %c0_49 = arith.constant 0 : index
    %c24 = arith.constant 24 : index
    %c0_50 = arith.constant 0 : index
    %55 = vector.load %arg9[%c0_49, %c24, %c0_50] : memref<1x32x256xf32, #tpu.memory_space<vmem>>, vector<1x8x256xf32>
    tpu.vector_store %arg9[%c0_49, %c24, %c0_50], %54 {strides = array<i32>} : memref<1x32x256xf32, #tpu.memory_space<vmem>>, vector<1x8x256xf32>,
    return
  }
  func.func @transform_0(%arg0: i32) -> (i32, i32, i32) {
    %c0_i32 = arith.constant 0 : i32
    %c0_i32_0 = arith.constant 0 : i32
    %c0_i32_1 = arith.constant 0 : i32
    return %arg0, %c0_i32, %c0_i32_0 : i32, i32, i32
  }
  func.func @transform_1(%arg0: i32) -> (i32, i32, i32) {
    %c0_i32 = arith.constant 0 : i32
    %c0_i32_0 = arith.constant 0 : i32
    %c0_i32_1 = arith.constant 0 : i32
    return %arg0, %c0_i32, %c0_i32_0 : i32, i32, i32
  }
  func.func @transform_2(%arg0: i32) -> (i32, i32, i32) {
    %c0_i32 = arith.constant 0 : i32
    %c0_i32_0 = arith.constant 0 : i32
    %c0_i32_1 = arith.constant 0 : i32
    return %arg0, %c0_i32, %c0_i32_0 : i32, i32, i32
  }
  func.func @transform_3(%arg0: i32) -> (i32, i32, i32) {
    %c0_i32 = arith.constant 0 : i32
    %c0_i32_0 = arith.constant 0 : i32
    %c0_i32_1 = arith.constant 0 : i32
    return %arg0, %c0_i32, %c0_i32_0 : i32, i32, i32
  }
  func.func @transform_4(%arg0: i32) -> (i32, i32) {
    %c0_i32 = arith.constant 0 : i32
    %c0_i32_0 = arith.constant 0 : i32
    %c0_i32_1 = arith.constant 0 : i32
    return %c0_i32, %c0_i32_0 : i32, i32
  }
  func.func @transform_5(%arg0: i32) -> (i32, i32) {
    %c0_i32 = arith.constant 0 : i32
    %c0_i32_0 = arith.constant 0 : i32
    %c0_i32_1 = arith.constant 0 : i32
    return %c0_i32, %c0_i32_0 : i32, i32
  }
  func.func @transform_6(%arg0: i32) -> (i32, i32) {
    %c0_i32 = arith.constant 0 : i32
    %c0_i32_0 = arith.constant 0 : i32
    %c0_i32_1 = arith.constant 0 : i32
    return %c0_i32, %c0_i32_0 : i32, i32
  }
  func.func @transform_7(%arg0: i32) -> (i32, i32) {
    %c0_i32 = arith.constant 0 : i32
    %c0_i32_0 = arith.constant 0 : i32
    %c0_i32_1 = arith.constant 0 : i32
    return %c0_i32, %c0_i32_0 : i32, i32
  }
  func.func @transform_8(%arg0: i32) -> (i32, i32, i32) {
    %c0_i32 = arith.constant 0 : i32
    %c0_i32_0 = arith.constant 0 : i32
    %c0_i32_1 = arith.constant 0 : i32
    return %arg0, %c0_i32, %c0_i32_0 : i32, i32, i32
  }
}

</mosaic_0001>

<bundles_post_ra>
// kernel: tpu_custom_call.1
= control target key start
LH: loop header
LB: loop body
LE: loop exit
PB: predicated region body
PF: predicated region fallthrough
CT: control target
= control target key end

     0   :  { %s1452_s0 = inlined_call_operand.vmem [shape: f32[2,8,256], index: 0, kind: input, shape index: {}]   ;;  %s1453_s1 = inlined_call_operand.hbm [shape: f32[2,8,256], index: 1, kind: input, shape index: {}]   ;;  %s1454_s2 = inlined_call_operand.hbm [shape: f32[2,8,256], index: 2, kind: input, shape index: {}]   ;;  %s1455_s3 = inlined_call_operand.hbm [shape: f32[2,8,256], index: 3, kind: input, shape index: {}]   ;;  %s1456_s4 = inlined_call_operand.vmem [shape: f32[32,8], index: 4, kind: input, shape index: {}]   ;;  %s1457_s5 = inlined_call_operand.vmem [shape: f32[1,8], index: 5, kind: input, shape index: {}]   ;;  %s1458_s6 = inlined_call_operand.vmem [shape: f32[8,32], index: 6, kind: input, shape index: {}]   ;;  %s1459_s7 = inlined_call_operand.vmem [shape: f32[1,32], index: 7, kind: input, shape index: {}]   ;;  %s1460_s8 = inlined_call_operand.hbm [shape: f32[2,32,256], index: 8, kind: output, shape index: {}]  }
   0x1   :  { %1471 = sst [smem:[#allocation17_spill]] %s1454_s2 }
   0x2   :  { %13 = vsyncpa [#allocation3], 0 }
   0x3   :  { %15 = vsyncpa [#allocation3 + $0x1], 0 }
   0x4   :  { %16 = vsyncpa [#allocation6], 0 }
   0x5   :  { %18 = vsyncpa [#allocation6 + $0x1], 0 }
   0x6   :  { %19 = vsyncpa [#allocation4], 0 }
   0x7   :  { %21 = vsyncpa [#allocation4 + $0x1], 0  ;;  %s1160_s27 = smov 0   ;;  %s1162_s28 = smov 0  }
   0x8   :  { %s1164_s29 = smov 0   ;;  %s1166_s30 = smov 0  }
   0x9 LB: > { %1472 = sst [smem:[#allocation12_spill]] %s1100_s29  ;;  %s1181_s9 = sadd.s32 4294967295, %s1104_s30   ;;  %s1104_s30 = sphi %s1166_s30, %s1495_s30   ;;  %s1100_s29 = sphi %s1164_s29, %s1497_s29   ;;  %s1096_s28 = sphi %s1162_s28, %s1499_s28   ;;  %s1092_s27 = sphi %s1160_s27, %s1498_s27  }
   0xa   : > { %1473 = sst [smem:[#allocation13_spill]] %s1104_s30  ;;  %s818_s10 = sadd.s32 4294967294, %s1104_s30  }
   0xb   : > { %s1185_s11 = sadd.s32 1, %s1104_s30   ;;  %s60_s12 = sadd.s32 1, %s1100_s29 }
   0xc   : > { %1474 = sst [smem:[#allocation14_spill]] %s1185_s11  ;;  %s57_s13 = ssub.s32 %s1104_s30, %s1185_s11 }
   0xd   : > { %p67_p0 = scmp.ne.s32.totalorder %s1100_s29, %s1096_s28  ;;  %p58_p1 = scmp.eq.s32.totalorder %s57_s13, 0 }
   0xe   : > { %p68_p2 = scmp.eq.s32.totalorder %s1104_s30, 0  ;;  %p73_p3 = scmp.ne.s32.totalorder %s1096_s28, %s1092_s27 }
   0xf   : > { %p74_p4 = scmp.eq.s32.totalorder %s1181_s9, 0  ;;  %p233_p7 = scmp.eq.s32.totalorder %s1181_s9, 1 }
  0x10   : > { %s1197_s14 = scalar_select %p58_p1, %s1100_s29, %s60_s12  }
  0x11   : > { %p69_p5 = por %p68_p2, %p67_p0  ;;  %p1199_p6 = por %p74_p4, %p73_p3 }
  0x12   : > { %1475 = sst [smem:[#allocation15_spill]] %s1197_s14  ;;  %p239_p8 = scmp.eq.s32.totalorder %s818_s10, 1 }
  0x13   : > { %s1476_s15 = scalar_select %p1199_p6, 1, 0 }
  0x14   : > { %p901_p10 = scmp.lt.s32.totalorder %s1104_s30, 2  ;;  %p1206_p11 = por %p233_p7, %p67_p0 }
  0x15   : > { %p1210_p12 = por %p239_p8, %p73_p3  ;;  %s1461_s18 = sand.u32 1, %s1100_s29  }
  0x16   : > { %s1477_s16 = scalar_select %p1206_p11, 1, 0 }
  0x17   : > { %s1478_s17 = scalar_select %p1210_p12, 1, 0 }
  0x18   : > { %s1216_s19 = sshll.u32 %s1104_s30, 8  ;;  %s1220_s20 = sshll.u32 %s1461_s18, 4 }
  0x19   : > { %1479 = sst [smem:[#allocation16_spill]] %s1478_s17  ;;  %p1222_p13 = pnand %p901_p10, %p69_p5 }
  0x1a   : > { %s298_s22 = sand.u32 1, %s1104_s30   ;;  %s1481_s2 = sld [smem:[#allocation17_spill]] }
  0x1b   : > { %s1480_s21 = scalar_select %p1222_p13, 1, 0 }
  0x1c   : > { %s302_s26 = scalar_lea.vmem [#allocation5], %s1220_s20  ;;  %s1237_s12 = scalar_lea.sflag [#allocation6], %s298_s22 }
  0x1d   : > { %s310_s10 = sshll.u32 %s302_s26, 4  ;;  %p1243_p2 = pneg %p1222_p13  ;;  %s1234_s10 = int_to_ptr.vmem [resolvable:$true] %s310_s10 }
  0x20   : > { %s1231_s25 = scalar_lea.hbm %s1481_s2, %s1216_s19  ;;  %s949_s26 = scalar_lea.hbm %s1481_s2, 512 }
  0x21   : > { %s944_s13 = scalar_lea.hbm %s1231_s25, 256  ;;  %p950_p5 = scmp.lt.u32.totalorder %s1231_s25, %s1481_s2 }
  0x22   : > { %p945_p1 = scmp.ne.s32.totalorder %s1231_s25, %s944_s13  ;;  %p951_p7 = scmp.lt.u32.totalorder %s949_s26, %s944_s13 }
  0x23   : > { %p953_p10 = scmp.lt.u32.totalorder %s944_s13, %s1231_s25 }
  0x24   : > { %p947_p3 = pnand %p1243_p2, %p945_p1  ;;  %p952_p8 = por %p951_p7, %p950_p5 }
  0x26   : > { %p948_p4 = pneg %p947_p3  ;;  %p954_p9 = por %p953_p10, %p952_p8 }
  0x28   : > { %p955_p0 = pnand %p954_p9, %p948_p4 }
  0x2a   : > { %958 = shalt.err (!%p955_p0)
}
  0x2b   : > { %s959_s22 = scalar_lea.vmem %s1234_s10, 256  ;;  %s1106_s23 = smov [#allocation5]  }
  0x2c   : > { %p960_p1 = scmp.ne.s32.totalorder %s1234_s10, %s959_s22  ;;  %s964_s24 = sshll.u32 %s1106_s23, 4  ;;  %s965_s24 = int_to_ptr.vmem [resolvable:$false] %s964_s24 }
  0x2d   : > { %s966_s11 = scalar_lea.vmem %s965_s24, 512  ;;  %p967_p11 = scmp.lt.s32.totalorder %s1234_s10, %s965_s24 }
  0x2e   : > { %p962_p3 = pnand %p960_p1, %p1243_p2  ;;  %p968_p6 = scmp.lt.s32.totalorder %s966_s11, %s959_s22 }
  0x30   : > { %p963_p12 = pneg %p962_p3  ;;  %p969_p5 = por %p968_p6, %p967_p11 }
  0x32   : > { %p970_p7 = pnand %p969_p5, %p963_p12 }
  0x34   : > { %973 = shalt.err (!%p970_p7)
}
  0x35   : > { %893 = dma.hbm_to_vmem [thread:$0]  (!%p1222_p13), %s1231_s25, 256, %s1234_s10, %s1237_s12  }
  0x36   : > { %p334_p9 = scmp.lt.s32.totalorder %s1104_s30, 3  ;;  %s1272_s26 = scalar_lea.hbm %s1453_s1, %s1216_s19 }
  0x37   : > { %p1483_p6 = scmp.ge.s32.totalorder %s1104_s30, 1  ;;  %s283_s23 = scalar_lea.vmem [#allocation2], %s1220_s20 }
  0x38   : > { %s291_s24 = sshll.u32 %s283_s23, 4  ;;  %s1485_s11 = sand.u32 1, %s1100_s29   ;;  %s292_s24 = int_to_ptr.vmem [resolvable:$true] %s291_s24 }
  0x39   : > { %p1276_p11 = pnand %p1483_p6, %p334_p9  ;;  %s280_s25 = scalar_lea.sflag [#allocation3], %s1485_s11 }
  0x3a   : > { %s974_s10 = scalar_lea.hbm %s1272_s26, 256  ;;  %s979_s2 = scalar_lea.hbm %s1453_s1, 512 }
  0x3b   : > { %s1484_s22 = scalar_select %p1276_p11, 1, 0 }
  0x3c   : > { %p975_p12 = scmp.ne.s32.totalorder %s1272_s26, %s974_s10  ;;  %p980_p8 = scmp.lt.u32.totalorder %s1272_s26, %s1453_s1 }
  0x3d   : > { %p981_p10 = scmp.lt.u32.totalorder %s979_s2, %s974_s10  ;;  %p983_p3 = scmp.lt.u32.totalorder %s974_s10, %s1272_s26 }
  0x3e   : > { %p977_p0 = pnand %p975_p12, %p1243_p2 }
  0x3f   : > { %p982_p1 = por %p981_p10, %p980_p8 }
  0x40   : > { %p978_p4 = pneg %p977_p0 }
  0x41   : > { %p984_p5 = por %p983_p3, %p982_p1 }
  0x43   : > { %p985_p7 = pnand %p984_p5, %p978_p4 }
  0x45   : > { %988 = shalt.err (!%p985_p7)
}
  0x46   : > { %s989_s23 = scalar_lea.vmem %s292_s24, 256  ;;  %s1107_s11 = smov [#allocation2]  }
  0x47   : > { %p990_p9 = scmp.ne.s32.totalorder %s292_s24, %s989_s23  ;;  %s994_s29 = sshll.u32 %s1107_s11, 4  ;;  %s995_s29 = int_to_ptr.vmem [resolvable:$false] %s994_s29 }
  0x48   : > { %s996_s14 = scalar_lea.vmem %s995_s29, 512  ;;  %p997_p0 = scmp.lt.s32.totalorder %s292_s24, %s995_s29 }
  0x49   : > { %p992_p6 = pnand %p990_p9, %p1243_p2  ;;  %p998_p11 = scmp.lt.s32.totalorder %s996_s14, %s989_s23 }
  0x4b   : > { %p993_p12 = pneg %p992_p6  ;;  %p999_p13 = por %p998_p11, %p997_p0 }
  0x4d   : > { %p1000_p8 = pnand %p999_p13, %p993_p12 }
  0x4f   : > { %1003 = shalt.err (!%p1000_p8)
}
  0x50   : > { %p1486_p10 = scmp.ne.s32.totalorder %s1480_s21, 0  ;;  %s1304_s17 = scalar_lea.hbm %s1455_s3, %s1216_s19 }
  0x51   : > { %s321_s29 = scalar_lea.vmem [#allocation7], %s1220_s20  ;;  %s1004_s13 = scalar_lea.hbm %s1304_s17, 256 }
  0x52   : > { %890 = dma.hbm_to_vmem [thread:$0]  (!%p1486_p10), %s1272_s26, 256, %s292_s24, %s280_s25  }
  0x53   : > { %s329_s10 = sshll.u32 %s321_s29, 4  ;;  %p1005_p13 = scmp.ne.s32.totalorder %s1304_s17, %s1004_s13  ;;  %s330_s10 = int_to_ptr.vmem [resolvable:$true] %s329_s10 }
  0x54   : > { %s1009_s26 = scalar_lea.hbm %s1455_s3, 512  ;;  %p1010_p1 = scmp.lt.u32.totalorder %s1304_s17, %s1455_s3 }
  0x55   : > { %p1007_p11 = pnand %p1005_p13, %p1243_p2  ;;  %p1011_p3 = scmp.lt.u32.totalorder %s1009_s26, %s1004_s13 }
  0x56   : > { %p1013_p7 = scmp.lt.u32.totalorder %s1004_s13, %s1304_s17 }
  0x57   : > { %p1008_p4 = pneg %p1007_p11  ;;  %p1012_p5 = por %p1011_p3, %p1010_p1 }
  0x59   : > { %p1014_p9 = por %p1013_p7, %p1012_p5 }
  0x5b   : > { %p1015_p6 = pnand %p1014_p9, %p1008_p4 }
  0x5d   : > { %1018 = shalt.err (!%p1015_p6)
}
  0x5e   : > { %s1019_s19 = scalar_lea.vmem %s330_s10, 256  ;;  %s1108_s20 = smov [#allocation7]  }
  0x5f   : > { %p1020_p12 = scmp.ne.s32.totalorder %s330_s10, %s1019_s19  ;;  %s1024_s14 = sshll.u32 %s1108_s20, 4  ;;  %s1025_s14 = int_to_ptr.vmem [resolvable:$false] %s1024_s14 }
  0x60   : > { %s1026_s2 = scalar_lea.vmem %s1025_s14, 512  ;;  %p1027_p13 = scmp.lt.s32.totalorder %s330_s10, %s1025_s14 }
  0x61   : > { %p1022_p0 = pnand %p1020_p12, %p1243_p2  ;;  %p1028_p11 = scmp.lt.s32.totalorder %s1026_s2, %s1019_s19 }
  0x63   : > { %p1023_p8 = pneg %p1022_p0  ;;  %p1029_p10 = por %p1028_p11, %p1027_p13 }
  0x65   : > { %p1030_p1 = pnand %p1029_p10, %p1023_p8 }
  0x67   : > { %1033 = shalt.err (!%p1030_p1)
}
  0x68   : > { %p1487_p3 = scmp.ne.s32.totalorder %s1480_s21, 0  ;;  %p1488_p4 = scmp.ne.s32.totalorder %s1484_s22, 0 }
  0x69   : > { %s1328_s18 = sand.u32 (!%p1488_p4), 1, %s1096_s28   ;;  %p1489_p2 = scmp.ne.s32.totalorder (!%p1488_p4), %s1476_s15, 0 }
  0x6a   : > { %896 = dma.hbm_to_vmem [thread:$0]  (!%p1487_p3), %s1304_s17, 256, %s330_s10, %s1237_s12  }
  0x6b   : > { %338 = sbr.rel (%p1488_p4) target bundleno = 878 (0x36e), region = 52  ;;  %s831_s30 = sshll.u32 (!%p1488_p4), %s1328_s18, 4 }
  0x6c   : > { %s341_s29 = scalar_lea.sflag (!%p1488_p4), [#allocation3], %s1328_s18  ;;  %s344_s13 = scalar_lea.vmem (!%p1488_p4), [#allocation2], %s831_s30 }
  0x72   : > { %1079 = dma.done.wait (%p1489_p2), %s341_s29, 256  }
  0x73   : > { %1081 = vsyncadd (%p1489_p2), %s341_s29, 4294967040  ;;  %s349_s21 = sand.u32 1, %s1181_s9   ;;  %s353_s22 = scalar_lea.vmem [#allocation5], %s831_s30 }
  0x74   : > { %s350_s12 = scalar_lea.sflag [#allocation6], %s349_s21 }
  0x75   : > { %1083 = dma.done.wait (%p1489_p2), %s350_s12, 512  }
  0x76   : > { %1085 = vsyncadd (%p1489_p2), %s350_s12, 4294966784  ;;  %p410_p10 = scmp.lt.s32.totalorder %s1181_s9, 1  ;;  %v1350_v2 = vld [vmem:[%s353_s22] sm:$0xff]  ;;  %v1354_v4 = vld [vmem:[%s353_s22 + $0x8] sm:$0xff]  ;;  %s362_s15 = scalar_lea.vmem [#allocation7], %s831_s30  ;;  %v1109_v15 = vmov 0.0|0.0   ;;  %v440_v20 = vlaneseq }
  0x77   : > { %v1356_v5 = vld [vmem:[%s344_s13] sm:$0xff]  ;;  %v1358_v6 = vld [vmem:[%s344_s13 + $0x8] sm:$0xff]  ;;  %v429_v7 = vadd.f32 %v1354_v4, %v1350_v2  ;;  %873 = vmatprep.subr.bf16.mxu0 %v1109_v15  ;;  %vm1110_vm0 = vmmov 0   ;;  %v1111_v19 = vmov 0.0   ;;  %vm468_vm1 = vcmask 64512   ;;  %s834_s23 = sshll.u32 %s1328_s18, 6 }
  0x78   : > { %s411_s17 = scalar_select %p410_p10, %s1181_s9, 1  ;;  %v1362_v8 = vld [vmem:[%s362_s15] sm:$0xff]  ;;  %v1364_v9 = vld [vmem:[%s362_s15 + $0x8] sm:$0xff]  ;;  %v423_v10 = vadd.f32 %v1358_v6, %v1356_v5  ;;  %865 = vmatprep.mubr.msk.f32.mxu0 %vm1110_vm0, %v1111_v19  ;;  %868 = vmatprep.subr.mxu1 %v1111_v19  ;;  %v441_v21 = vand.u32 127, %v440_v20  ;;  %v443_v22 = vshrl.u32 %v440_v20, 7  ;;  %vm470_vm2 = vcmask 130048  }
  0x79   : > { %430 = vadd.xlane.f32.xlu1 %v429_v7  ;;  %v435_v11 = vadd.f32 %v1364_v9, %v1362_v8  ;;  %v474_v12 = vld [vmem:[%s1456_s4] sm:$0xff]  ;;  %v475_v13 = vld [vmem:[%s1456_s4 + $0x8] sm:$0xff]  ;;  %v476_v16 = vld [vmem:[%s1456_s4 + $0x10] sm:$0xff]  ;;  %870 = vmatprep.mubr.msk.f32.mxu1 %vm1110_vm0, %v1111_v19  ;;  %vm472_vm3 = vcmask 195584   ;;  %vm479_vm4 = vcmask 261120   ;;  %s409_s11 = scalar_lea.vmem [#allocation8], %s834_s23 }
  0x7a   : > { %s848_s10 = sshll.u32 %s411_s17, 4  ;;  %v874_v14 = vpack.c.bf16 %v475_v13, %v474_v12  ;;  %v477_v17 = vld [vmem:[%s1456_s4 + $0x18] sm:$0xff]  ;;  %v448_v23 = vadd.s32 4294967288, %v441_v21  ;;  %v455_v25 = vadd.s32 4294967280, %v441_v21  ;;  %v462_v26 = vadd.s32 4294967272, %v441_v21  ;;  %v554_v45 = vld [vmem:[%s1458_s6] sm:$0xff] }
  0x7b   : > { %s414_s26 = scalar_lea.vmem %s1452_s0, %s848_s10  ;;  %v877_v18 = vpack.c.bf16 %v477_v17, %v476_v16  ;;  %v444_v28 = vsub.s32 %v441_v21, %v443_v22  ;;  %869 = vmatpush3.msra.mxu1 %v554_v45  ;;  %v478_v46 = vld [vmem:[%s1457_s5] sm:$0x1]  ;;  %v637_v58 = vsub.s32 0, %v443_v22  ;;  %s849_s15 = sshll.u32 %s1181_s9, 10 }
  0x7c   : > { %v1346_v0 = vld [vmem:[%s414_s26] sm:$0xff]  ;;  %v1348_v1 = vld [vmem:[%s414_s26 + $0x8] sm:$0xff]  ;;  %875 = vmatpush3.bf16.msra.mxu0 %v874_v14  ;;  %v451_v30 = vsub.s32 %v448_v23, %v443_v22  ;;  %v458_v31 = vsub.s32 %v455_v25, %v443_v22  ;;  %v465_v34 = vsub.s32 %v462_v26, %v443_v22  ;;  %s690_s26 = sshll.u32 %s409_s11, 4  ;;  %s1406_s19 = scalar_lea.hbm %s1460_s8, %s849_s15  ;;  %s1401_s26 = int_to_ptr.vmem [resolvable:$true] %s690_s26 }
  0x7d   : > { %v417_v3 = vadd.f32 %v1348_v1, %v1346_v0  ;;  %436 = vadd.xlane.f32.xlu1 %v435_v11  ;;  %876 = vmatprep.subr.bf16.mxu0 %v1109_v15  ;;  %v555_v51 = vld [vmem:[%s1459_s7] sm:$0x1]  ;;  %s677_s9 = scalar_lea.sflag [#allocation4], %s1328_s18  ;;  %s1034_s20 = scalar_lea.vmem %s1401_s26, 1024 }
  0x7e   : > { %p1035_p5 = scmp.ne.s32.totalorder %s1401_s26, %s1034_s20  ;;  %p1490_p7 = scmp.ne.s32.totalorder %s1477_s16, 0 }
  0x7f   : > { %418 = vadd.xlane.f32.xlu0 %v417_v3  ;;  %s1112_s14 = smov [#allocation8]  }
  0x80   : > { %878 = vmatpush3.bf16.msra.mxu0 %v877_v18  ;;  %p1036_p9 = pnand %p1035_p5, %p1490_p7  ;;  %s1038_s2 = sshll.u32 %s1112_s14, 4  ;;  %s1039_s2 = int_to_ptr.vmem [resolvable:$false] %s1038_s2 }
  0x81   : > { %s1040_s30 = scalar_lea.vmem %s1039_s2, 2048  ;;  %p1041_p12 = scmp.lt.s32.totalorder %s1401_s26, %s1039_s2 }
  0x82   : > { %p1037_p6 = pneg %p1036_p9  ;;  %p1042_p0 = scmp.lt.s32.totalorder %s1040_s30, %s1034_s20 }
  0x83   : > { %424 = vadd.xlane.f32.xlu0 %v423_v10 }
  0x84   : > { %p1043_p8 = por %p1042_p0, %p1041_p12 }
  0x86   : > { %p1044_p13 = pnand %p1043_p8, %p1037_p6 }
 0x106   : > { %v431_v27 = vpop.xlane.xlu1 %430 }
 0x107   : > { %v432_v32 = vmul.f32 0.00390625, %v431_v27 }
 0x109   : > { %v459_v40 = vrot.slane %v432_v32, %v458_v31 }
 0x10a   : > { %v437_v36 = vpop.xlane.xlu1 %436 }
 0x10b   : > { %v438_v37 = vmul.f32 0.00390625, %v437_v36 }
 0x10c   : > { %v419_v24 = vpop.xlane.xlu0 %418 }
 0x10d   : > { %v420_v29 = vmul.f32 0.00390625, %v419_v24  ;;  %v466_v41 = vrot.slane %v438_v37, %v465_v34 }
 0x10f   : > { %v445_v38 = vrot.slane %v420_v29, %v444_v28 }
 0x110   : > { %v425_v33 = vpop.xlane.xlu0 %424 }
 0x111   : > { %v426_v35 = vmul.f32 0.00390625, %v425_v33 }
 0x113   : > { %v452_v39 = vrot.slane %v426_v35, %v451_v30 }
 0x115   : > { %v469_v42 = vsel %vm468_vm1, %v445_v38, %v452_v39 }
 0x116   : > { %v471_v43 = vsel %vm470_vm2, %v469_v42, %v459_v40 }
 0x117   : > { %v473_v44 = vsel %vm472_vm3, %v471_v43, %v466_v41 }
 0x118   : > { %866 = vmatmul.mubr.msk.f32.vlgmr.msra.gmra.mrb[0].mxu0 %vm479_vm4, %v473_v44 }
 0x1eb   : > { %v549_v47 = vpop.f32.mrb[0].mxu0 }
 0x1ec   : > { %v550_v48 = vadd.f32 %v549_v47, %v478_v46  ;;  %v867_v49 = vpop.f32.mrb[1].mxu0 }
 0x1ee   : > { %v553_v50 = vmax.f32 %v550_v48, 0.0 }
 0x1f0   : > { %871 = vmatmul.mubr.msk.f32.vlgmr.msra.gmra.mrb[0].mxu1 %vm468_vm1, %v553_v50 }
 0x2c3   : > { %v625_v52 = vpop.f32.mrb[0].mxu1 }
 0x2c4   : > { %v626_v53 = vadd.f32 %v625_v52, %v555_v51  ;;  %v872_v54 = vpop.f32.mrb[1].mxu1 }
 0x2c6   : > { %v839_v55 = vmul.f32 -1.442695, %v626_v53 }
 0x2c8   : > { %940 = vpow2.f32 %v839_v55 }
 0x2d2   : > { %v941_v56 = vpop.eup %940 }
 0x2d3   : > { %v632_v57 = vadd.f32 1.0, %v941_v56 }
 0x2d5   : > { %942 = vrcp.f32 %v632_v57 }
 0x2df   : > { %v943_v59 = vpop.eup %942 }
 0x2e0   : > { %v638_v60 = vrot.slane %v943_v59, %v637_v58 }
 0x2e2   : > { %650 = vbcast.lane.b32.xlu1 %v638_v60, 264  ;;  %640 = vbcast.lane.b32.xlu0 %v638_v60, 256 }
 0x2e6   : > { %660 = vbcast.lane.b32.xlu1 %v638_v60, 272 }
 0x2ea   : > { %670 = vbcast.lane.b32.xlu1 %v638_v60, 280 }
 0x354   : > { %v651_v61 = vpop.permute.xlu1 %650  ;;  %v641_v62 = vpop.permute.xlu0 %640 }
 0x355   : > { %v652_v63 = vmul.f32 %v651_v61, %v1356_v5  ;;  %v653_v3 = vmul.f32 %v651_v61, %v1358_v6  ;;  %v642_v7 = vmul.f32 %v641_v62, %v1346_v0  ;;  %v643_v10 = vmul.f32 %v641_v62, %v1348_v1 }
 0x357   : > { %654 = vst [vmem:[%s409_s11 + $0x10] sm:$0xff] %v652_v63  ;;  %655 = vst [vmem:[%s409_s11 + $0x18] sm:$0xff] %v653_v3 }
 0x358   : > { %644 = vst [vmem:[%s409_s11] sm:$0xff] %v642_v7  ;;  %645 = vst [vmem:[%s409_s11 + $0x8] sm:$0xff] %v643_v10  ;;  %v661_v11 = vpop.permute.xlu1 %660 }
 0x359   : > { %v662_v12 = vmul.f32 %v661_v11, %v1350_v2  ;;  %v663_v13 = vmul.f32 %v661_v11, %v1354_v4 }
 0x35b   : > { %664 = vst [vmem:[%s409_s11 + $0x20] sm:$0xff] %v662_v12  ;;  %665 = vst [vmem:[%s409_s11 + $0x28] sm:$0xff] %v663_v13 }
 0x35c   : > { %v671_v0 = vpop.permute.xlu1 %670 }
 0x35d   : > { %v672_v1 = vmul.f32 %v671_v0, %v1362_v8  ;;  %v673_v2 = vmul.f32 %v671_v0, %v1364_v9 }
 0x35f   : > { %674 = vst [vmem:[%s409_s11 + $0x30] sm:$0xff] %v672_v1  ;;  %675 = vst [vmem:[%s409_s11 + $0x38] sm:$0xff] %v673_v2 }
 0x360   : > { %1047 = shalt.err (!%p1044_p13)
}
 0x361   : > { %s1048_s29 = scalar_lea.hbm %s1406_s19, 1024  ;;  %s1052_s12 = scalar_lea.hbm %s1460_s8, 2048 }
 0x362   : > { %p1049_p11 = scmp.ne.s32.totalorder %s1406_s19, %s1048_s29  ;;  %p1053_p4 = scmp.lt.u32.totalorder %s1406_s19, %s1460_s8 }
 0x363   : > { %p1054_p2 = scmp.lt.u32.totalorder %s1052_s12, %s1048_s29  ;;  %p1056_p5 = scmp.lt.u32.totalorder %s1048_s29, %s1406_s19 }
 0x364   : > { %p1050_p1 = pnand %p1049_p11, %p1490_p7 }
 0x365   : > { %p1055_p10 = por %p1054_p2, %p1053_p4 }
 0x366   : > { %p1051_p3 = pneg %p1050_p1 }
 0x367   : > { %p1057_p9 = por %p1056_p5, %p1055_p10 }
 0x369   : > { %p1058_p6 = pnand %p1057_p9, %p1051_p3 }
 0x36b   : > { %1061 = shalt.err (!%p1058_p6)
}
 0x36c   : > { %s1113_s10 = smov 256   ;;  %s1114_s23 = smov 16  }
 0x36d   : > { %885 = dma.vmem_to_hbm [thread:$0]  (%p1490_p7), %s1401_s26, 1024, %s1406_s19, %s677_s9, %s1113_s10, %s1113_s10, %s1114_s23  }
 0x36e PF: > { %s1491_s11 = sld [smem:[#allocation16_spill]]  ;;  %s1492_s15 = sld [smem:[#allocation13_spill]] }
 0x36f   : > { %s705_s24 = sand.u32 1, %s1092_s27  }
 0x370   : > { %s706_s25 = scalar_lea.sflag [#allocation4], %s705_s24 }
 0x374   : > { %p1493_p12 = scmp.ne.s32.totalorder %s1491_s11, 0  ;;  %p1494_p0 = scmp.ge.s32.totalorder %s1492_s15, 2 }
 0x376   : > { %p898_p8 = pnand %p1494_p0, %p1493_p12 }
 0x378   : > { %1087 = dma.done.wait (!%p898_p8), %s706_s25, 1024  }
 0x379   : > { %1089 = vsyncadd (!%p898_p8), %s706_s25, 4294966272  ;;  %s1495_s30 = sld [smem:[#allocation14_spill]]  ;;  %s1496_s20 = sld [smem:[#allocation12_spill]] }
 0x37a   : > { %s1497_s29 = sld [smem:[#allocation15_spill]]  ;;  %s1498_s27 = smov %s1096_s28 }
 0x37f   : > { %p24_p13 = scmp.ge.s32.totalorder %s1495_s30, 4   ;;  %s1499_s28 = smov %s1496_s20 }
 0x381   :  { %26 = sbr.rel (!%p24_p13) target bundleno = 9 (0x9), region = 124 }
 0x388   :  { %711 = vsyncpa [#allocation3], 1 }
 0x389   :  { %713 = vsyncpa [#allocation3 + $0x1], 1 }
 0x38a   :  { %714 = vsyncpa [#allocation6], 1 }
 0x38b   :  { %716 = vsyncpa [#allocation6 + $0x1], 1 }
 0x38c   :  { %717 = vsyncpa [#allocation4], 1 }
 0x38d   :  { %719 = vsyncpa [#allocation4 + $0x1], 1 }

</bundles_post_ra>
